<compile_context>
chip_gen: v5e
topology: v5e:2x2
jax: 0.10.0
libtpu: 0.0.40
codegen_flags: <defaults>
</compile_context>

<pallas_src>
import functools

import jax
import jax.numpy as jnp
from jax.experimental import pallas as pl
from jax.experimental.pallas import tpu as pltpu


def _mm_kernel_single_k(patches_ref, filt_ref, out_ref):
    """Single K-block: out = patches @ filt_pos, no accumulator scratch."""
    out_ref[...] = jnp.dot(
        patches_ref[...], filt_ref[...], preferred_element_type=jnp.float32
    ).astype(out_ref.dtype)


def _mm_kernel_multi_k(patches_ref, filt_ref, out_ref, acc_ref):
    """Multi K-block matmul with folded accumulator epilogue.

    patches_ref : (TM, TK) compute_dtype   -- im2col patch tile (zero-padded)
    filt_ref    : (TK, TN) compute_dtype   -- activated (tanh+1) filter, (K, O) layout
    out_ref     : (TM, TN) f32
    acc_ref     : (TM, TN) f32 VMEM scratch (resident across the K axis)
    """
    k = pl.program_id(2)
    nk = pl.num_programs(2)

    prod = jnp.dot(patches_ref[...], filt_ref[...], preferred_element_type=jnp.float32)

    @pl.when(k == 0)
    def _():
        acc_ref[...] = prod                      # no zero-fill pass

    @pl.when(jnp.logical_and(k > 0, k < nk - 1))
    def _():
        acc_ref[...] += prod

    @pl.when(k == nk - 1)
    def _():
        # Last step: read acc once, add, write out (skip the acc store round-trip).
        out_ref[...] = (acc_ref[...] + prod).astype(out_ref.dtype)


def _round_up(x, m):
    return (x + m - 1) // m * m


@functools.partial(jax.jit, static_argnames=("kh", "kw", "compute_dtype"))
def monotonic_conv2d(x, filters, *, kh, kw, compute_dtype=jnp.bfloat16):
    """Forward pass of MonotonicConv2d (stride=1, padding=0, dilation=1, groups=1).

    x:       (N, C, H, W)         float32, NCHW
    filters: (O, C, KH, KW)       float32 (raw, pre tanh+1)
    returns: (N, O, H_out, W_out) float32
    """
    N, C, H, W = x.shape
    O = filters.shape[0]
    H_out = H - kh + 1
    W_out = W - kw + 1
    K = C * kh * kw
    M = N * H_out * W_out

    # --- monotonic weight transform, applied ONCE on the tiny filter (wrapper-side) --
    filt_pos = jnp.tanh(filters.astype(jnp.float32)) + 1.0              # (O, C, KH, KW)
    # K-order (kh, kw, c) to match the NHWC patches below, then (K, O) for the MXU.
    filt_ko = jnp.transpose(filt_pos, (0, 2, 3, 1)).reshape(O, K).T     # (K, O) f32

    # --- im2col (XLA glue), NHWC so K is already the last axis (no big transpose) ----
    x_nhwc = jnp.transpose(x.astype(compute_dtype), (0, 2, 3, 1))       # (N, H, W, C)
    cols = []
    for i in range(kh):
        for j in range(kw):
            cols.append(x_nhwc[:, i:i + H_out, j:j + W_out, :])         # (N,Ho,Wo,C)
    patches = jnp.concatenate(cols, axis=-1).reshape(M, K)              # (M, K), K last

    # --- tile sizes: lane-dense, sized for the MXU and the VMEM budget ---------------
    TM = min(2048, _round_up(M, 128))
    TN = min(512, _round_up(O, 128))
    TK = min(512, _round_up(K, 128))
    if TK > 128:                      # prefer 256-multiples for the 2x256x256 MXUs
        TK = min(512, _round_up(TK, 256))
    Mp = _round_up(M, TM)
    Op = _round_up(O, TN)
    Kp = _round_up(K, TK)

    # Megacore (v7x): expose >= 2 blocks on a "parallel" axis when possible.
    if Mp // TM == 1 and Op // TN == 1 and Mp > 128:
        TM = max(128, _round_up(Mp // 2, 128))
        Mp = _round_up(M, TM)

    grid = (Mp // TM, Op // TN, Kp // TK)
    multi_k = grid[2] > 1

    patches_p = jnp.pad(patches, ((0, Mp - M), (0, Kp - K)))            # compute_dtype
    filt_p = jnp.pad(filt_ko, ((0, Kp - K), (0, Op - O))).astype(compute_dtype)

    in_item = jnp.dtype(compute_dtype).itemsize
    vmem_bytes = (2 * TM * TK * in_item            # patches double buffer
                  + 2 * TK * TN * in_item          # filter double buffer
                  + 2 * TM * TN * 4                # output double buffer
                  + (TM * TN * 4 if multi_k else 0))   # f32 accumulator scratch
    vmem_limit = int(min(48 << 20, max(2 * vmem_bytes, 16 << 20)))

    cost = pl.CostEstimate(
        flops=2 * Mp * Kp * Op,
        transcendentals=0,                               # tanh hoisted to the wrapper
        bytes_accessed=(grid[1] * Mp * Kp * in_item      # patches re-read per N block
                        + grid[0] * Kp * Op * in_item    # filter re-read per M block
                        + Mp * Op * 4),                  # f32 output
    )

    in_specs = [
        pl.BlockSpec((TM, TK), lambda i, j, k: (i, k)),
        pl.BlockSpec((TK, TN), lambda i, j, k: (k, j)),
    ]
    out_spec = pl.BlockSpec((TM, TN), lambda i, j, k: (i, j))
    common = dict(
        out_shape=jax.ShapeDtypeStruct((Mp, Op), jnp.float32),
        compiler_params=pltpu.CompilerParams(
            dimension_semantics=("parallel", "parallel", "arbitrary"),
            vmem_limit_bytes=vmem_limit,
        ),
        cost_estimate=cost,
    )

    if multi_k:
        out_p = pl.pallas_call(
            _mm_kernel_multi_k,
            grid_spec=pltpu.PrefetchScalarGridSpec(
                num_scalar_prefetch=0,
                grid=grid,
                in_specs=in_specs,
                out_specs=out_spec,
                scratch_shapes=[pltpu.VMEM((TM, TN), jnp.float32)],
            ),
            **common,
        )(patches_p, filt_p)
    else:
        out_p = pl.pallas_call(
            _mm_kernel_single_k,
            grid_spec=pltpu.PrefetchScalarGridSpec(
                num_scalar_prefetch=0,
                grid=grid,
                in_specs=in_specs,
                out_specs=out_spec,
            ),
            **common,
        )(patches_p, filt_p)

    # --- un-pad and restore NCHW ------------------------------------------------------
    out = out_p[:M, :O].reshape(N, H_out, W_out, O)
    return jnp.transpose(out, (0, 3, 1, 2))                  # (N, O, H_out, W_out)


if __name__ == "__main__":
    key = jax.random.PRNGKey(0)
    kx, kf, kx2, kf2 = jax.random.split(key, 4)

    # Small shapes consistent with the module: NCHW input, (O, C, KH, KW) filters.
    N, C, H, W = 2, 4, 16, 16
    O, KH, KW = 8, 3, 3

    x = jax.random.normal(kx, (N, C, H, W), dtype=jnp.float32)
    filters = jax.random.normal(kf, (O, C, KH, KW), dtype=jnp.float32)  # ~ torch.randn

    def reference(x_, f_):
        f_pos = jnp.tanh(f_) + 1.0
        return jax.lax.conv_general_dilated(
            x_, f_pos, window_strides=(1, 1), padding="VALID",
            dimension_numbers=("NCHW", "OIHW", "NCHW"),
            precision=jax.lax.Precision.HIGHEST,
        )

    y_ref = reference(x, filters)

    # 1) f32 MXU path: tight check vs the f32 conv reference.
    y_f32 = jax.block_until_ready(
        monotonic_conv2d(x, filters, kh=KH, kw=KW, compute_dtype=jnp.float32))
    assert y_f32.shape == (N, O, H - KH + 1, W - KW + 1), y_f32.shape
    assert jnp.allclose(y_f32, y_ref, atol=1e-4, rtol=1e-4), float(
        jnp.max(jnp.abs(y_f32 - y_ref)))

    # 2) Fast bf16-input / f32-accumulate path: loose check (bf16 rounding of the
    #    patches and the activated filter; intentionally not conv2d-exact).
    y_bf16 = jax.block_until_ready(
        monotonic_conv2d(x, filters, kh=KH, kw=KW, compute_dtype=jnp.bfloat16))
    assert y_bf16.shape == (N, O, H - KH + 1, W - KW + 1), y_bf16.shape
    max_err = float(jnp.max(jnp.abs(y_bf16 - y_ref)))
    mean_err = float(jnp.mean(jnp.abs(y_bf16 - y_ref)))
    assert max_err < 0.3 and mean_err < 0.03, (max_err, mean_err)

    # 3) Wider-channel case to exercise the multi-K (accumulator) grid path.
    C2 = 64
    x2 = jax.random.normal(kx2, (N, C2, H, W), dtype=jnp.float32)
    filters2 = jax.random.normal(kf2, (O, C2, KH, KW), dtype=jnp.float32)
    y2_ref = reference(x2, filters2)
    y2 = jax.block_until_ready(
        monotonic_conv2d(x2, filters2, kh=KH, kw=KW, compute_dtype=jnp.float32))
    assert y2.shape == y2_ref.shape, (y2.shape, y2_ref.shape)
    assert jnp.allclose(y2, y2_ref, atol=2e-3, rtol=2e-3), float(
        jnp.max(jnp.abs(y2 - y2_ref)))

    print("KERNEL_OK")
</pallas_src>

<mosaic_0001>
module attributes {stable_mosaic.version = 11 : i64} {
  func.func @_mm_kernel_single_k(%arg0: i32, %arg1: i32, %arg2: i32, %arg3: memref<256x128xf32, #tpu.memory_space<vmem>>, %arg4: memref<128x128xf32, #tpu.memory_space<vmem>>, %arg5: memref<256x128xf32, #tpu.memory_space<vmem>>) attributes {dimension_semantics = [#tpu.dimension_semantics<parallel>, #tpu.dimension_semantics<parallel>, #tpu.dimension_semantics<arbitrary>], iteration_bounds = array<i64: 2, 1, 1>, scalar_prefetch = 0 : i64, scratch_operands = 0 : i64, tpu.core_type = #tpu.core_type<tc>, window_params = [{transform_indices = @transform_0, window_bounds = array<i64: 256, 128>}, {transform_indices = @transform_1, window_bounds = array<i64: 128, 128>}, {transform_indices = @transform_2, window_bounds = array<i64: 256, 128>}]} {
    %c0 = arith.constant 0 : index
    %c0_0 = arith.constant 0 : index
    %0 = vector.load %arg3[%c0, %c0_0] : memref<256x128xf32, #tpu.memory_space<vmem>>, vector<256x128xf32>
    %c0_1 = arith.constant 0 : index
    %c0_2 = arith.constant 0 : index
    %1 = vector.load %arg4[%c0_1, %c0_2] : memref<128x128xf32, #tpu.memory_space<vmem>>, vector<128x128xf32>
    %cst = arith.constant dense<0.000000e+00> : vector<256x128xf32>
    %2 = tpu.matmul %0, %1, %cst {dimension_numbers = #tpu.dot_dimension_numbers<[1], [0], [0], [1], [0, 0, 1, 1], [], []>} : vector<256x128xf32>, vector<128x128xf32>, vector<256x128xf32> -> vector<256x128xf32>
    %c0_3 = arith.constant 0 : index
    %c0_4 = arith.constant 0 : index
    %3 = vector.load %arg5[%c0_3, %c0_4] : memref<256x128xf32, #tpu.memory_space<vmem>>, vector<256x128xf32>
    tpu.vector_store %arg5[%c0_3, %c0_4], %2 {strides = array<i32>} : memref<256x128xf32, #tpu.memory_space<vmem>>, vector<256x128xf32>,
    return
  }
  func.func @transform_0(%arg0: i32, %arg1: i32, %arg2: i32) -> (i32, i32) {
    %c0_i32 = arith.constant 0 : i32
    return %arg0, %arg2 : i32, i32
  }
  func.func @transform_1(%arg0: i32, %arg1: i32, %arg2: i32) -> (i32, i32) {
    %c0_i32 = arith.constant 0 : i32
    return %arg2, %arg1 : i32, i32
  }
  func.func @transform_2(%arg0: i32, %arg1: i32, %arg2: i32) -> (i32, i32) {
    %c0_i32 = arith.constant 0 : i32
    return %arg0, %arg1 : i32, i32
  }
}

</mosaic_0001>

<bundles_post_ra>
// kernel: monotonic_conv2d.1
= control target key start
LH: loop header
LB: loop body
LE: loop exit
PB: predicated region body
PF: predicated region fallthrough
CT: control target
= control target key end

     0   :  { %s633_s9 = smov 0   ;;  %s635_s10 = smov 0   ;;  %s792_s0 = inlined_call_operand.vmem [shape: f32[512,128], index: 0, kind: input, shape index: {}]   ;;  %s793_s1 = inlined_call_operand.vmem [shape: f32[128,128], index: 1, kind: input, shape index: {}]   ;;  %s794_s2 = inlined_call_operand.vmem [shape: f32[512,128], index: 2, kind: output, shape index: {}]  }
   0x1   :  { %s637_s11 = smov 0  }
   0x2 LB: > { %s31_s12 = sadd.s32 1, %s612_s10  ;;  %p515_p0 = scmp.ge.s32.totalorder %s616_s11, 1  ;;  %s616_s11 = sphi %s637_s11, %s12_s11   ;;  %s612_s10 = sphi %s635_s10, %s796_s10   ;;  %s608_s9 = sphi %s633_s9, %s795_s9  }
   0x3   : > { %p33_p1 = scmp.ge.s32.totalorder %s31_s12, 2  ;;  %p155_p2 = scmp.lt.s32.totalorder %s616_s11, 3 }
   0x5   : > { %s798_s12 = smov (%p33_p1, %s31_s12), 0  ;;  %p156_p3 = pnand %p515_p0, %p155_p2 }
   0x6   : > { %s516_s29 = sshll.u32 (!%p156_p3), %s608_s9, 5 }
   0x7   : > { %159 = sbr.rel (%p156_p3) target bundleno = 234 (0xea), region = 28  ;;  %p192_p4 = scmp.lt.s32.totalorder (!%p156_p3), %s516_s29, 63 }
   0xc   : > { %v265_v0 = vld [vmem:[%s793_s1 + $0x78] sm:$0xff]  ;;  %v264_v1 = vld [vmem:[%s793_s1 + $0x70] sm:$0xff]  ;;  %v263_v2 = vld [vmem:[%s793_s1 + $0x68] sm:$0xff]  ;;  %s800_s29 = smov (!%p192_p4, %s516_s29), 63 }
   0xd   : > { %523 = vmatpush.msra.mxu2 %v265_v0  ;;  %524 = vmatpush.msra.mxu3 %v265_v0  ;;  %v262_v3 = vld [vmem:[%s793_s1 + $0x60] sm:$0xff]  ;;  %v261_v4 = vld [vmem:[%s793_s1 + $0x58] sm:$0xff]  ;;  %v260_v5 = vld [vmem:[%s793_s1 + $0x50] sm:$0xff]  ;;  %s517_s15 = sshll.u32 %s800_s29, 3 }
   0xe   : > { %266 = vmatpush.msra.mxu0 %v265_v0  ;;  %522 = vmatpush.msra.mxu1 %v265_v0  ;;  %v259_v6 = vld [vmem:[%s793_s1 + $0x48] sm:$0xff]  ;;  %v258_v7 = vld [vmem:[%s793_s1 + $0x40] sm:$0xff]  ;;  %v257_v8 = vld [vmem:[%s793_s1 + $0x38] sm:$0xff]  ;;  %s707_s22 = scalar_lea.vmem %s792_s0, %s517_s15  ;;  %s749_s27 = scalar_lea.vmem %s794_s2, %s517_s15 }
   0xf   : > { %526 = vmatpush.msra.mxu2 %v264_v1  ;;  %527 = vmatpush.msra.mxu3 %v264_v1  ;;  %v256_v9 = vld [vmem:[%s793_s1 + $0x30] sm:$0xff]  ;;  %v255_v10 = vld [vmem:[%s793_s1 + $0x28] sm:$0xff]  ;;  %v254_v11 = vld [vmem:[%s793_s1 + $0x20] sm:$0xff] }
  0x10   : > { %267 = vmatpush.msra.mxu0 %v264_v1  ;;  %525 = vmatpush.msra.mxu1 %v264_v1  ;;  %v253_v12 = vld [vmem:[%s793_s1 + $0x18] sm:$0xff]  ;;  %v252_v13 = vld [vmem:[%s793_s1 + $0x10] sm:$0xff]  ;;  %v251_v14 = vld [vmem:[%s793_s1 + $0x8] sm:$0xff] }
  0x11   : > { %529 = vmatpush.msra.mxu2 %v263_v2  ;;  %530 = vmatpush.msra.mxu3 %v263_v2  ;;  %v250_v15 = vld [vmem:[%s793_s1] sm:$0xff]  ;;  %v235_v20 = vld [vmem:[%s707_s22 + $0x88] sm:$0xff]  ;;  %v236_v24 = vld [vmem:[%s707_s22 + $0x90] sm:$0xff] }
  0x12   : > { %268 = vmatpush.msra.mxu0 %v263_v2  ;;  %528 = vmatpush.msra.mxu1 %v263_v2  ;;  %v234_v16 = vld [vmem:[%s707_s22 + $0x80] sm:$0xff]  ;;  %v243_v21 = vld [vmem:[%s707_s22 + $0xc8] sm:$0xff]  ;;  %v244_v25 = vld [vmem:[%s707_s22 + $0xd0] sm:$0xff] }
  0x13   : > { %532 = vmatpush.msra.mxu2 %v262_v3  ;;  %533 = vmatpush.msra.mxu3 %v262_v3  ;;  %v242_v17 = vld [vmem:[%s707_s22 + $0xc0] sm:$0xff]  ;;  %v219_v22 = vld [vmem:[%s707_s22 + $0x8] sm:$0xff]  ;;  %v220_v26 = vld [vmem:[%s707_s22 + $0x10] sm:$0xff] }
  0x14   : > { %269 = vmatpush.msra.mxu0 %v262_v3  ;;  %531 = vmatpush.msra.mxu1 %v262_v3  ;;  %v218_v18 = vld [vmem:[%s707_s22] sm:$0xff]  ;;  %v227_v23 = vld [vmem:[%s707_s22 + $0x48] sm:$0xff]  ;;  %v228_v27 = vld [vmem:[%s707_s22 + $0x50] sm:$0xff] }
  0x15   : > { %535 = vmatpush.msra.mxu2 %v261_v4  ;;  %536 = vmatpush.msra.mxu3 %v261_v4  ;;  %v226_v19 = vld [vmem:[%s707_s22 + $0x40] sm:$0xff]  ;;  %v237_v28 = vld [vmem:[%s707_s22 + $0x98] sm:$0xff]  ;;  %v239_v36 = vld [vmem:[%s707_s22 + $0xa8] sm:$0xff] }
  0x16   : > { %270 = vmatpush.msra.mxu0 %v261_v4  ;;  %534 = vmatpush.msra.mxu1 %v261_v4  ;;  %v245_v29 = vld [vmem:[%s707_s22 + $0xd8] sm:$0xff]  ;;  %v238_v32 = vld [vmem:[%s707_s22 + $0xa0] sm:$0xff]  ;;  %v247_v37 = vld [vmem:[%s707_s22 + $0xe8] sm:$0xff] }
  0x17   : > { %538 = vmatpush.msra.mxu2 %v260_v5  ;;  %539 = vmatpush.msra.mxu3 %v260_v5  ;;  %v221_v30 = vld [vmem:[%s707_s22 + $0x18] sm:$0xff]  ;;  %v246_v33 = vld [vmem:[%s707_s22 + $0xe0] sm:$0xff]  ;;  %v223_v38 = vld [vmem:[%s707_s22 + $0x28] sm:$0xff] }
  0x18   : > { %271 = vmatpush.msra.mxu0 %v260_v5  ;;  %537 = vmatpush.msra.mxu1 %v260_v5  ;;  %v229_v31 = vld [vmem:[%s707_s22 + $0x58] sm:$0xff]  ;;  %v222_v34 = vld [vmem:[%s707_s22 + $0x20] sm:$0xff]  ;;  %v231_v39 = vld [vmem:[%s707_s22 + $0x68] sm:$0xff] }
  0x19   : > { %541 = vmatpush.msra.mxu2 %v259_v6  ;;  %542 = vmatpush.msra.mxu3 %v259_v6  ;;  %v230_v35 = vld [vmem:[%s707_s22 + $0x60] sm:$0xff]  ;;  %v240_v40 = vld [vmem:[%s707_s22 + $0xb0] sm:$0xff]  ;;  %v241_v44 = vld [vmem:[%s707_s22 + $0xb8] sm:$0xff] }
  0x1a   : > { %272 = vmatpush.msra.mxu0 %v259_v6  ;;  %540 = vmatpush.msra.mxu1 %v259_v6  ;;  %v248_v41 = vld [vmem:[%s707_s22 + $0xf0] sm:$0xff]  ;;  %v249_v45 = vld [vmem:[%s707_s22 + $0xf8] sm:$0xff] }
  0x1b   : > { %544 = vmatpush.msra.mxu2 %v258_v7  ;;  %545 = vmatpush.msra.mxu3 %v258_v7  ;;  %v224_v42 = vld [vmem:[%s707_s22 + $0x30] sm:$0xff]  ;;  %v225_v46 = vld [vmem:[%s707_s22 + $0x38] sm:$0xff] }
  0x1c   : > { %273 = vmatpush.msra.mxu0 %v258_v7  ;;  %543 = vmatpush.msra.mxu1 %v258_v7  ;;  %v232_v43 = vld [vmem:[%s707_s22 + $0x70] sm:$0xff]  ;;  %v233_v47 = vld [vmem:[%s707_s22 + $0x78] sm:$0xff] }
  0x1d   : > { %547 = vmatpush.msra.mxu2 %v257_v8  ;;  %548 = vmatpush.msra.mxu3 %v257_v8 }
  0x1e   : > { %274 = vmatpush.msra.mxu0 %v257_v8  ;;  %546 = vmatpush.msra.mxu1 %v257_v8 }
  0x1f   : > { %550 = vmatpush.msra.mxu2 %v256_v9  ;;  %551 = vmatpush.msra.mxu3 %v256_v9 }
  0x20   : > { %275 = vmatpush.msra.mxu0 %v256_v9  ;;  %549 = vmatpush.msra.mxu1 %v256_v9 }
  0x21   : > { %553 = vmatpush.msra.mxu2 %v255_v10  ;;  %554 = vmatpush.msra.mxu3 %v255_v10 }
  0x22   : > { %276 = vmatpush.msra.mxu0 %v255_v10  ;;  %552 = vmatpush.msra.mxu1 %v255_v10 }
  0x23   : > { %556 = vmatpush.msra.mxu2 %v254_v11  ;;  %557 = vmatpush.msra.mxu3 %v254_v11 }
  0x24   : > { %277 = vmatpush.msra.mxu0 %v254_v11  ;;  %555 = vmatpush.msra.mxu1 %v254_v11 }
  0x25   : > { %559 = vmatpush.msra.mxu2 %v253_v12  ;;  %560 = vmatpush.msra.mxu3 %v253_v12 }
  0x26   : > { %278 = vmatpush.msra.mxu0 %v253_v12  ;;  %558 = vmatpush.msra.mxu1 %v253_v12 }
  0x27   : > { %562 = vmatpush.msra.mxu2 %v252_v13  ;;  %563 = vmatpush.msra.mxu3 %v252_v13 }
  0x28   : > { %279 = vmatpush.msra.mxu0 %v252_v13  ;;  %561 = vmatpush.msra.mxu1 %v252_v13 }
  0x29   : > { %565 = vmatpush.msra.mxu2 %v251_v14  ;;  %566 = vmatpush.msra.mxu3 %v251_v14 }
  0x2a   : > { %280 = vmatpush.msra.mxu0 %v251_v14  ;;  %564 = vmatpush.msra.mxu1 %v251_v14 }
  0x2b   : > { %568 = vmatpush.msra.mxu2 %v250_v15  ;;  %569 = vmatpush.msra.mxu3 %v250_v15 }
  0x2c   : > { %330 = vmatmul.f32.vlgmr.msra.gmra.mxu2 %v234_v16  ;;  %354 = vmatmul.f32.vlgmr.msra.gmra.mxu3 %v242_v17 }
  0x2d   : > { %281 = vmatpush.msra.mxu0 %v250_v15  ;;  %567 = vmatpush.msra.mxu1 %v250_v15 }
  0x2e   : > { %282 = vmatmul.f32.vlgmr.msra.gmra.mxu0 %v218_v18  ;;  %306 = vmatmul.f32.vlgmr.msra.gmra.mxu1 %v226_v19 }
  0x34   : > { %333 = vmatmul.f32.gmra.mxu2 %v235_v20  ;;  %357 = vmatmul.f32.gmra.mxu3 %v243_v21 }
  0x36   : > { %285 = vmatmul.f32.gmra.mxu0 %v219_v22  ;;  %309 = vmatmul.f32.gmra.mxu1 %v227_v23 }
  0x3c   : > { %336 = vmatmul.f32.gmra.mxu2 %v236_v24  ;;  %360 = vmatmul.f32.gmra.mxu3 %v244_v25 }
  0x3e   : > { %288 = vmatmul.f32.gmra.mxu0 %v220_v26  ;;  %312 = vmatmul.f32.gmra.mxu1 %v228_v27 }
  0x44   : > { %339 = vmatmul.f32.gmra.mxu2 %v237_v28  ;;  %363 = vmatmul.f32.gmra.mxu3 %v245_v29 }
  0x46   : > { %291 = vmatmul.f32.gmra.mxu0 %v221_v30  ;;  %315 = vmatmul.f32.gmra.mxu1 %v229_v31 }
  0x4c   : > { %342 = vmatmul.f32.gmra.mxu2 %v238_v32  ;;  %366 = vmatmul.f32.gmra.mxu3 %v246_v33 }
  0x4e   : > { %294 = vmatmul.f32.gmra.mxu0 %v222_v34  ;;  %318 = vmatmul.f32.gmra.mxu1 %v230_v35 }
  0x54   : > { %345 = vmatmul.f32.gmra.mxu2 %v239_v36  ;;  %369 = vmatmul.f32.gmra.mxu3 %v247_v37 }
  0x56   : > { %297 = vmatmul.f32.gmra.mxu0 %v223_v38  ;;  %321 = vmatmul.f32.gmra.mxu1 %v231_v39 }
  0x5c   : > { %348 = vmatmul.f32.gmra.mxu2 %v240_v40  ;;  %372 = vmatmul.f32.gmra.mxu3 %v248_v41 }
  0x5e   : > { %300 = vmatmul.f32.gmra.mxu0 %v224_v42  ;;  %324 = vmatmul.f32.gmra.mxu1 %v232_v43 }
  0x64   : > { %351 = vmatmul.f32.gmra.mxu2 %v241_v44  ;;  %375 = vmatmul.f32.gmra.mxu3 %v249_v45 }
  0x66   : > { %303 = vmatmul.f32.gmra.mxu0 %v225_v46  ;;  %327 = vmatmul.f32.gmra.mxu1 %v233_v47 }
  0xab   : > { %v283_v48 = vpop.f32.mrf.mxu0  ;;  %v307_v49 = vpop.f32.mrf.mxu1 }
  0xac   : > { %379 = vst [vmem:[%s749_s27] sm:$0xff] %v283_v48 }
  0xad   : > { %387 = vst [vmem:[%s749_s27 + $0x40] sm:$0xff] %v307_v49 }
  0xaf   : > { %v331_v50 = vpop.f32.mrf.mxu2  ;;  %v355_v51 = vpop.f32.mrf.mxu3 }
  0xb0   : > { %395 = vst [vmem:[%s749_s27 + $0x80] sm:$0xff] %v331_v50 }
  0xb1   : > { %403 = vst [vmem:[%s749_s27 + $0xc0] sm:$0xff] %v355_v51 }
  0xb3   : > { %v286_v52 = vpop.f32.mrf.mxu0  ;;  %v310_v53 = vpop.f32.mrf.mxu1 }
  0xb4   : > { %380 = vst [vmem:[%s749_s27 + $0x8] sm:$0xff] %v286_v52 }
  0xb5   : > { %388 = vst [vmem:[%s749_s27 + $0x48] sm:$0xff] %v310_v53 }
  0xb7   : > { %v334_v54 = vpop.f32.mrf.mxu2  ;;  %v358_v55 = vpop.f32.mrf.mxu3 }
  0xb8   : > { %396 = vst [vmem:[%s749_s27 + $0x88] sm:$0xff] %v334_v54 }
  0xb9   : > { %404 = vst [vmem:[%s749_s27 + $0xc8] sm:$0xff] %v358_v55 }
  0xbb   : > { %v289_v56 = vpop.f32.mrf.mxu0  ;;  %v313_v57 = vpop.f32.mrf.mxu1 }
  0xbc   : > { %381 = vst [vmem:[%s749_s27 + $0x10] sm:$0xff] %v289_v56 }
  0xbd   : > { %389 = vst [vmem:[%s749_s27 + $0x50] sm:$0xff] %v313_v57 }
  0xbf   : > { %v337_v58 = vpop.f32.mrf.mxu2  ;;  %v361_v59 = vpop.f32.mrf.mxu3 }
  0xc0   : > { %397 = vst [vmem:[%s749_s27 + $0x90] sm:$0xff] %v337_v58 }
  0xc1   : > { %405 = vst [vmem:[%s749_s27 + $0xd0] sm:$0xff] %v361_v59 }
  0xc3   : > { %v292_v60 = vpop.f32.mrf.mxu0  ;;  %v316_v61 = vpop.f32.mrf.mxu1 }
  0xc4   : > { %382 = vst [vmem:[%s749_s27 + $0x18] sm:$0xff] %v292_v60 }
  0xc5   : > { %390 = vst [vmem:[%s749_s27 + $0x58] sm:$0xff] %v316_v61 }
  0xc7   : > { %v340_v62 = vpop.f32.mrf.mxu2  ;;  %v364_v63 = vpop.f32.mrf.mxu3 }
  0xc8   : > { %398 = vst [vmem:[%s749_s27 + $0x98] sm:$0xff] %v340_v62 }
  0xc9   : > { %406 = vst [vmem:[%s749_s27 + $0xd8] sm:$0xff] %v364_v63 }
  0xcb   : > { %v295_v0 = vpop.f32.mrf.mxu0  ;;  %v319_v1 = vpop.f32.mrf.mxu1 }
  0xcc   : > { %383 = vst [vmem:[%s749_s27 + $0x20] sm:$0xff] %v295_v0 }
  0xcd   : > { %391 = vst [vmem:[%s749_s27 + $0x60] sm:$0xff] %v319_v1 }
  0xcf   : > { %v343_v2 = vpop.f32.mrf.mxu2  ;;  %v367_v3 = vpop.f32.mrf.mxu3 }
  0xd0   : > { %399 = vst [vmem:[%s749_s27 + $0xa0] sm:$0xff] %v343_v2 }
  0xd1   : > { %407 = vst [vmem:[%s749_s27 + $0xe0] sm:$0xff] %v367_v3 }
  0xd3   : > { %v298_v4 = vpop.f32.mrf.mxu0  ;;  %v322_v5 = vpop.f32.mrf.mxu1 }
  0xd4   : > { %384 = vst [vmem:[%s749_s27 + $0x28] sm:$0xff] %v298_v4 }
  0xd5   : > { %392 = vst [vmem:[%s749_s27 + $0x68] sm:$0xff] %v322_v5 }
  0xd7   : > { %v346_v6 = vpop.f32.mrf.mxu2  ;;  %v370_v7 = vpop.f32.mrf.mxu3 }
  0xd8   : > { %400 = vst [vmem:[%s749_s27 + $0xa8] sm:$0xff] %v346_v6 }
  0xd9   : > { %408 = vst [vmem:[%s749_s27 + $0xe8] sm:$0xff] %v370_v7 }
  0xdb   : > { %v301_v8 = vpop.f32.mrf.mxu0  ;;  %v325_v9 = vpop.f32.mrf.mxu1 }
  0xdc   : > { %385 = vst [vmem:[%s749_s27 + $0x30] sm:$0xff] %v301_v8 }
  0xdd   : > { %393 = vst [vmem:[%s749_s27 + $0x70] sm:$0xff] %v325_v9 }
  0xdf   : > { %v349_v10 = vpop.f32.mrf.mxu2  ;;  %v373_v11 = vpop.f32.mrf.mxu3 }
  0xe0   : > { %401 = vst [vmem:[%s749_s27 + $0xb0] sm:$0xff] %v349_v10 }
  0xe1   : > { %409 = vst [vmem:[%s749_s27 + $0xf0] sm:$0xff] %v373_v11 }
  0xe3   : > { %v304_v12 = vpop.f32.mrf.mxu0  ;;  %v328_v13 = vpop.f32.mrf.mxu1 }
  0xe4   : > { %386 = vst [vmem:[%s749_s27 + $0x38] sm:$0xff] %v304_v12 }
  0xe5   : > { %394 = vst [vmem:[%s749_s27 + $0x78] sm:$0xff] %v328_v13 }
  0xe7   : > { %v352_v14 = vpop.f32.mrf.mxu2  ;;  %v376_v15 = vpop.f32.mrf.mxu3 }
  0xe8   : > { %402 = vst [vmem:[%s749_s27 + $0xb8] sm:$0xff] %v352_v14 }
  0xe9   : > { %410 = vst [vmem:[%s749_s27 + $0xf8] sm:$0xff] %v376_v15 }
  0xea PF: > { %s12_s11 = sadd.s32 1, %s616_s11   ;;  %s795_s9 = smov %s612_s10 }
  0xeb   : > { %p9_p5 = scmp.ge.s32.totalorder %s12_s11, 4   ;;  %s796_s10 = smov %s798_s12 }
  0xed   :  { %11 = sbr.rel (!%p9_p5) target bundleno = 2 (0x2), region = 61 }

</bundles_post_ra>
